<compile_context>
chip_gen: v5e
topology: v5e:2x2
jax: 0.10.0
libtpu: 0.0.40
codegen_flags: <defaults>
</compile_context>

<pallas_src>
import functools

import jax
import jax.numpy as jnp
import numpy as np
from jax.experimental import pallas as pl
from jax.experimental.pallas import tpu as pltpu


# ----------------------------------------------------------------------------
# Python-side vocab construction (mirrors EmbeddingLayer.word_counter)
# ----------------------------------------------------------------------------
def build_vocab(data):
    d = {}
    d['EOS'] = 1
    d['SOS'] = 1
    for sentence in data:
        for word in sentence.split(' '):
            d[word] = 1
    words = list(d.keys())
    onehot_size = len(words) + 2          # same quirk as the reference module
    word_to_idx = {w: i for i, w in enumerate(words)}
    return word_to_idx, onehot_size


def _round_up(x, m):
    return (x + m - 1) // m * m


def _round_down(x, m):
    return (x // m) * m


# ----------------------------------------------------------------------------
# Pallas kernel: token ids -> one-hot tile
# ----------------------------------------------------------------------------
MAX_TILE_S = 512                     # sublane tile cap (multiple of 8)
OUT_TILE_BYTES = 4 * 1024 * 1024     # per-output-buffer VMEM budget (x2 buffered)


def _onehot_kernel(ids_ref, out_ref, *, v_axis):
    """ids_ref: (TS, 1) int32 token ids for this row tile.
       out_ref: (TS, TV) block (i, j) of the one-hot matrix."""
    j = pl.program_id(v_axis)
    TS, TV = out_ref.shape
    # (TS,1) subtract instead of adding j*TV to the whole (TS,TV) iota:
    # one fewer VALU op per output vreg.
    local = ids_ref[...] - j * TV                                     # (TS, 1)
    cols = jax.lax.broadcasted_iota(jnp.int32, (TS, TV), 1)           # (TS, TV)
    out_ref[...] = (cols == local).astype(out_ref.dtype)


def onehot_pallas(ids, onehot_size, *, out_dtype=jnp.bfloat16):
    """ids: (seq,) int32 token indices. Returns (seq, onehot_size) one-hot."""
    seq = int(ids.shape[0])
    onehot_size = int(onehot_size)
    assert seq >= 1
    dsize = jnp.dtype(out_dtype).itemsize

    # Hardware-granular tiling only: block dims are (8,128)-multiples, the
    # out_shape stays exact, and edge blocks are partial (masked stores), so no
    # padded bytes ever reach HBM and no post-kernel slice is needed.
    TS = min(MAX_TILE_S, _round_up(seq, 8))
    tv_budget = max(128, _round_down(OUT_TILE_BYTES // (TS * dsize), 128))
    TV = min(_round_up(onehot_size, 128), tv_budget)

    grid_s = pl.cdiv(seq, TS)
    grid_v = pl.cdiv(onehot_size, TV)

    # ids as a skinny lane-1 column (no 128-lane HBM broadcast). Pad rows to a
    # whole S-tile with -1 so every ids block load is full; -1 never matches a
    # column index and those rows fall outside the output anyway.
    s_ids = grid_s * TS
    ids_col = jnp.full((s_ids, 1), -1, dtype=jnp.int32).at[:seq, 0].set(
        ids.astype(jnp.int32))

    # Megacore (v7x): lead with the grid axis that has more tiles so both
    # TensorCores get work; single-TC chips ignore the ordering.
    if grid_v >= grid_s:
        grid = (grid_v, grid_s)
        v_axis = 0
        ids_map = lambda j, i: (i, 0)
        out_map = lambda j, i: (i, j)
    else:
        grid = (grid_s, grid_v)
        v_axis = 1
        ids_map = lambda i, j: (i, 0)
        out_map = lambda i, j: (i, j)

    return pl.pallas_call(
        functools.partial(_onehot_kernel, v_axis=v_axis),
        out_shape=jax.ShapeDtypeStruct((seq, onehot_size), out_dtype),
        grid=grid,
        in_specs=[pl.BlockSpec((TS, 1), ids_map)],
        out_specs=pl.BlockSpec((TS, TV), out_map),
        compiler_params=pltpu.CompilerParams(
            dimension_semantics=("parallel", "parallel")),
        cost_estimate=pl.CostEstimate(
            flops=0, transcendentals=0,
            bytes_accessed=seq * onehot_size * dsize + s_ids * 4),
    )(ids_col)


# ----------------------------------------------------------------------------
# EmbeddingLayer equivalent
# ----------------------------------------------------------------------------
class EmbeddingLayerPallas:
    def __init__(self, data):
        self.word_to_idx, self.onehot_size = build_vocab(data)
        self.output_size = len(self.word_to_idx)

    def _encode(self, sentence):
        # Unknown words KeyError exactly like the reference.
        return jnp.asarray([self.word_to_idx[w] for w in sentence.split(' ')],
                           dtype=jnp.int32)

    def forward(self, x: str, out_dtype=jnp.bfloat16):
        # tokens = ['SOS'] + x.split(' ') + ['EOS']   # built but unused, as in reference
        return onehot_pallas(self._encode(x), self.onehot_size,
                             out_dtype=out_dtype)

    def forward_batch(self, sentences, out_dtype=jnp.bfloat16):
        """All sentences in ONE pallas_call. Returns (packed, offsets); rows
        offsets[i]:offsets[i+1] of `packed` are sentence i's one-hot rows
        (no per-sentence slices are materialized)."""
        words_per = [s.split(' ') for s in sentences]
        ids = jnp.asarray(
            [self.word_to_idx[w] for ws in words_per for w in ws],
            dtype=jnp.int32)
        offsets = np.cumsum([0] + [len(w) for w in words_per])
        packed = onehot_pallas(ids, self.onehot_size, out_dtype=out_dtype)
        return packed, offsets


# ----------------------------------------------------------------------------
# Demo / self-check
# ----------------------------------------------------------------------------
if __name__ == "__main__":
    # Synthetic deterministic "data" (stands in for pd.read_csv('input.csv')).
    data = [
        "the cat sat on the mat",
        "a dog ran over the hill",
        "birds sing in the morning",
    ]
    layer = EmbeddingLayerPallas(data)

    def ref_onehot(sentence):
        idx = np.array([layer.word_to_idx[w] for w in sentence.split(' ')])
        ref = np.zeros((idx.shape[0], layer.onehot_size), dtype=np.float32)
        ref[np.arange(idx.shape[0]), idx] = 1.0
        return ref

    # Deterministic input sentence of seq=8 words chosen via PRNGKey(0).
    vocab_words = [w for w in layer.word_to_idx if w not in ('SOS', 'EOS')]
    key = jax.random.PRNGKey(0)
    picks = jax.random.randint(key, (8,), 0, len(vocab_words))
    sentence = ' '.join(vocab_words[int(i)] for i in picks)

    # Single-sentence forward (matches the reference module's shape contract).
    out = jax.block_until_ready(layer.forward(sentence))
    assert out.shape == (8, layer.onehot_size), out.shape
    assert out.dtype == jnp.bfloat16, out.dtype
    np.testing.assert_array_equal(np.asarray(out).astype(np.float32),
                                  ref_onehot(sentence))

    # f32 output path still supported.
    out32 = jax.block_until_ready(layer.forward(sentence, out_dtype=jnp.float32))
    np.testing.assert_array_equal(np.asarray(out32), ref_onehot(sentence))

    # Batched path: many sentences, one kernel launch, no per-sentence slices.
    packed, offs = layer.forward_batch(data + [sentence])
    jax.block_until_ready(packed)
    packed_np = np.asarray(packed).astype(np.float32)
    for i, s in enumerate(data + [sentence]):
        np.testing.assert_array_equal(packed_np[offs[i]:offs[i + 1]],
                                      ref_onehot(s))

    print("KERNEL_OK")
</pallas_src>

<mosaic_0001>
module attributes {stable_mosaic.version = 11 : i64} {
  func.func @_onehot_kernel(%arg0: i32, %arg1: i32, %arg2: memref<8x1xi32, #tpu.memory_space<vmem>>, %arg3: memref<8x128xbf16, #tpu.memory_space<vmem>>) attributes {dimension_semantics = [#tpu.dimension_semantics<parallel>, #tpu.dimension_semantics<parallel>], iteration_bounds = array<i64: 1, 1>, scalar_prefetch = 0 : i64, scratch_operands = 0 : i64, tpu.core_type = #tpu.core_type<tc>, window_params = [{transform_indices = @transform_0, window_bounds = array<i64: 8, 1>}, {transform_indices = @transform_1, window_bounds = array<i64: 8, 128>}]} {
    %c0 = arith.constant 0 : index
    %c0_0 = arith.constant 0 : index
    %0 = vector.load %arg2[%c0, %c0_0] : memref<8x1xi32, #tpu.memory_space<vmem>>, vector<8x1xi32>
    %c128_i32 = arith.constant 128 : i32
    %1 = arith.muli %arg0, %c128_i32 : i32
    %2 = vector.broadcast %1 : i32 to vector<8x1xi32>
    %3 = arith.subi %0, %2 : vector<8x1xi32>
    %4 = tpu.iota {dimensions = array<i32: 1>} : vector<8x128xi32>
    %5 = vector.broadcast %3 : vector<8x1xi32> to vector<8x128xi32>
    %6 = arith.cmpi eq, %4, %5 : vector<8x128xi32>
    %7 = arith.extui %6 : vector<8x128xi1> to vector<8x128xi32>
    %8 = arith.sitofp %7 : vector<8x128xi32> to vector<8x128xf32>
    %9 = arith.truncf %8 : vector<8x128xf32> to vector<8x128xbf16>
    %c0_1 = arith.constant 0 : index
    %c0_2 = arith.constant 0 : index
    %10 = vector.load %arg3[%c0_1, %c0_2] : memref<8x128xbf16, #tpu.memory_space<vmem>>, vector<8x128xbf16>
    tpu.vector_store %arg3[%c0_1, %c0_2], %9 {strides = array<i32>} : memref<8x128xbf16, #tpu.memory_space<vmem>>, vector<8x128xbf16>,
    return
  }
  func.func @transform_0(%arg0: i32, %arg1: i32) -> (i32, i32) {
    %c0_i32 = arith.constant 0 : i32
    %c0_i32_0 = arith.constant 0 : i32
    return %arg1, %c0_i32 : i32, i32
  }
  func.func @transform_1(%arg0: i32, %arg1: i32) -> (i32, i32) {
    %c0_i32 = arith.constant 0 : i32
    return %arg1, %arg0 : i32, i32
  }
}

</mosaic_0001>

<bundles_post_ra>
// kernel: tpu_custom_call.1
= control target key start
LH: loop header
LB: loop body
LE: loop exit
PB: predicated region body
PF: predicated region fallthrough
CT: control target
= control target key end

     0   :  { %s89_s0 = inlined_call_operand.vmem [shape: s32[8,1], index: 0, kind: input, shape index: {}]   ;;  %s90_s1 = inlined_call_operand.hbm [shape: bf16[8,18], index: 1, kind: output, shape index: {}]  }
   0x1   :  { %v9_v0 = vld [vmem:[%s89_s0] sm:$0xff] }
   0x2   :  { %6 = vsyncpa [#allocation3], 0  ;;  %v70_v1 = vmov 0   ;;  %v13_v2 = vlaneseq  ;;  %s71_s8 = smov [#allocation2]   ;;  %s30_s12 = sshll.u32 %s90_s1, 4  ;;  %v72_v5 = vmov 0.0   ;;  %s31_s12 = int_to_ptr.hbm [resolvable:$true] %s30_s12 }
   0x3   :  { %43 = vset.pattern.permute.xlu0 %v70_v1  ;;  %s28_s9 = sshll.u32 %s71_s8, 4  ;;  %s29_s9 = int_to_ptr.vmem [resolvable:$true] %s28_s9 }
   0x4   :  { %16 = vperm.xlu0 %43, %v9_v0   ;;  %v14_v3 = vand.u32 127, %v13_v2 }
  0x76   :  { %v17_v4 = vpop.permute.xlu0 %16 }
  0x77   :  { %vm18_vm0 = vcmp.eq.s32.totalorder %v14_v3, %v17_v4 }
  0x78   :  { %v39_v6 = vsel %vm18_vm0, 1.0, %v72_v5 }
  0x79   :  { %v21_v7 = vpack.c.bf16 %v39_v6, %v39_v6 }
  0x7b   :  { %22 = vst [vmem:[#allocation2] sm:$0xf] %v21_v7 }
  0x7c   :  { %33 = dma.vmem_to_hbm [thread:$0]  %s29_s9, 64, %s31_s12, [#allocation3]  }
  0x7d   :  { %68 = dma.done.wait [#allocation3], 64  }
  0x7e   :  { %69 = vsyncadd [#allocation3], 4294967232 }
  0x7f   :  { %38 = vsyncpa [#allocation3], 1 }

</bundles_post_ra>
